<compile_context>
chip_gen: v7x
topology: tpu7x:2x2x1
jax: 0.10.0
libtpu: 0.0.40
codegen_flags: <defaults>
</compile_context>

<pallas_src>
import functools

import jax
import jax.numpy as jnp
from jax import lax
from jax.experimental import pallas as pl
from jax.experimental.pallas import tpu as pltpu


def _embedding_kernel(ids_ref, table_ref, out_ref, *, tile_rows, pack, vp):
    # ids_ref:   (n_rows, pack) int32  -- full (untiled) padded id matrix
    # table_ref: (pack*vp, pack*d)     -- block-diagonal embedding table
    # out_ref:   (tile_rows, pack*d)   -- packed, lane-dense output tile
    i = pl.program_id(0)
    row0 = pl.multiple_of(i * tile_rows, 8)
    ids = ids_ref[pl.ds(row0, tile_rows), :]                      # (tile_rows, pack)

    dt = table_ref.dtype
    lanes = lax.broadcasted_iota(jnp.int32, (tile_rows, pack * vp), 1)
    one_hot = jnp.zeros((tile_rows, pack * vp), dtype=dt)
    for c in range(pack):                                         # static unroll
        idc = ids[:, c:c + 1]                                     # (tile_rows, 1)
        valid = (idc >= 0) & (idc < vp)
        target = jnp.where(valid, idc + c * vp, -1)               # OOV -> no hit
        one_hot = one_hot + (lanes == target).astype(dt)

    out_ref[...] = jnp.dot(one_hot, table_ref[...],
                           preferred_element_type=jnp.float32).astype(out_ref.dtype)


@functools.partial(jax.jit, static_argnames=("tm",))
def embedding_forward(token_ids, table, *, tm=512):
    """token_ids: [m, T] int, table: [V, D] -> [m, T, D] (table dtype)."""
    m, t = token_ids.shape
    v, d = table.shape
    n = m * t
    out_dtype = table.dtype

    # --- lane-dense packing factor: fold `pack` tokens per 128-lane output row.
    pack = (128 // d) if (d < 128 and 128 % d == 0) else 1
    row_align = 8 * pack                       # token tile must be a multiple
    tm_eff = max(row_align, (tm // row_align) * row_align)
    tm_eff = min(tm_eff, pl.cdiv(n, row_align) * row_align)   # tiny input -> grid=1
    n_pad = pl.cdiv(n, tm_eff) * tm_eff
    n_rows = n_pad // pack
    tile_rows = tm_eff // pack
    grid = (n_pad // tm_eff,)

    # --- vocab padded to a lane-full multiple of 128 (zero rows).
    vp = ((v + 127) // 128) * 128
    tbl = jnp.pad(table, ((0, vp - v), (0, 0)))
    # Block-diagonal table so the packed one-hot matmul emits pack*D lanes/row.
    big_table = tbl if pack == 1 else jnp.kron(jnp.eye(pack, dtype=tbl.dtype), tbl)

    # --- ids: flatten, pad, reshape to (n_rows, pack); passed untiled.
    flat_ids = token_ids.reshape(n).astype(jnp.int32)
    flat_ids = jnp.pad(flat_ids, (0, n_pad - n))
    ids2 = flat_ids.reshape(n_rows, pack)

    kernel = functools.partial(_embedding_kernel,
                               tile_rows=tile_rows, pack=pack, vp=vp)

    out = pl.pallas_call(
        kernel,
        out_shape=jax.ShapeDtypeStruct((n_rows, pack * d), out_dtype),
        grid_spec=pltpu.PrefetchScalarGridSpec(
            num_scalar_prefetch=0,
            grid=grid,
            in_specs=[
                # all token ids, untiled: single small copy, revisited each step
                pl.BlockSpec((n_rows, pack), lambda i: (0, 0)),
                # full (block-diagonal) table, resident across the grid
                pl.BlockSpec((pack * vp, pack * d), lambda i: (0, 0)),
            ],
            out_specs=pl.BlockSpec((tile_rows, pack * d), lambda i: (i, 0)),
        ),
        compiler_params=pltpu.CompilerParams(
            dimension_semantics=("parallel",)),
    )(ids2, big_table)

    # Row-major unpack back to one token per row, drop padding.
    return out.reshape(n_pad, d)[:n].reshape(m, t, d)


if __name__ == "__main__":
    # Module config: nn.Embedding(V.max_size, E_dim)
    V_SIZE = 64      # vocabulary max_size
    E_DIM = 32       # embedding dim
    M = 2            # batch of examples
    T = 8            # max_num_1d_tokens

    key = jax.random.PRNGKey(0)
    k_table, k_ids = jax.random.split(key)

    # Deterministic parameter init (matches nn.Embedding's [V, E_dim] weight shape).
    table = jax.random.normal(k_table, (V_SIZE, E_DIM), dtype=jnp.float32)
    # Input token ids: [m, max_num_1d_tokens]
    token_ids = jax.random.randint(k_ids, (M, T), 0, V_SIZE, dtype=jnp.int32)

    out = embedding_forward(token_ids, table)
    out = jax.block_until_ready(out)

    # Reference: plain gather, same semantics as nn.Embedding.forward.
    ref = jnp.take(table, token_ids, axis=0)

    assert out.shape == (M, T, E_DIM), out.shape
    assert out.dtype == jnp.float32
    assert jnp.allclose(out, ref, atol=1e-5, rtol=1e-5), "mismatch vs reference"

    print("KERNEL_OK")
</pallas_src>

<mosaic_0001>
module attributes {stable_mosaic.version = 11 : i64} {
  func.func @_embedding_kernel(%arg0: i32, %arg1: memref<8x4xi32, #tpu.memory_space<vmem>>, %arg2: memref<512x128xf32, #tpu.memory_space<vmem>>, %arg3: memref<8x128xf32, #tpu.memory_space<vmem>>) attributes {dimension_semantics = [#tpu.dimension_semantics<parallel>], iteration_bounds = array<i64: 1>, scalar_prefetch = 0 : i64, scratch_operands = 0 : i64, tpu.core_type = #tpu.core_type<tc>, window_params = [{pipeline_mode = #tpu.pipeline_mode<synchronous>, transform_indices = @transform_0, window_bounds = array<i64: 8, 4>}, {pipeline_mode = #tpu.pipeline_mode<synchronous>, transform_indices = @transform_1, window_bounds = array<i64: 512, 128>}, {transform_indices = @transform_2, window_bounds = array<i64: 8, 128>}]} {
    %c8_i32 = arith.constant 8 : i32
    %0 = arith.muli %arg0, %c8_i32 : i32
    %1 = tpu.assume_multiple %0, 8 : i32
    %2 = arith.index_cast %1 : i32 to index
    %c0 = arith.constant 0 : index
    %3 = vector.load %arg1[%2, %c0] : memref<8x4xi32, #tpu.memory_space<vmem>>, vector<8x4xi32>
    %4 = tpu.iota {dimensions = array<i32: 1>} : vector<8x512xi32>
    %cst = arith.constant 0.000000e+00 : f32
    %5 = vector.broadcast %cst : f32 to vector<8x512xf32>
    %6 = vector.extract_strided_slice %3 {offsets = [0, 0], sizes = [8, 1], strides = [1, 1]} : vector<8x4xi32> to vector<8x1xi32>
    %c0_i32 = arith.constant 0 : i32
    %7 = vector.broadcast %c0_i32 : i32 to vector<8x1xi32>
    %8 = arith.cmpi sge, %6, %7 : vector<8x1xi32>
    %c128_i32 = arith.constant 128 : i32
    %9 = vector.broadcast %c128_i32 : i32 to vector<8x1xi32>
    %10 = arith.cmpi slt, %6, %9 : vector<8x1xi32>
    %11 = arith.andi %8, %10 : vector<8x1xi1>
    %c0_i32_0 = arith.constant 0 : i32
    %12 = vector.broadcast %c0_i32_0 : i32 to vector<8x1xi32>
    %13 = arith.addi %6, %12 : vector<8x1xi32>
    %c-1_i32 = arith.constant -1 : i32
    %14 = vector.broadcast %c-1_i32 : i32 to vector<8x1xi32>
    %15 = arith.select %11, %13, %14 : vector<8x1xi1>, vector<8x1xi32>
    %16 = vector.broadcast %15 : vector<8x1xi32> to vector<8x512xi32>
    %17 = arith.cmpi eq, %4, %16 : vector<8x512xi32>
    %18 = arith.extui %17 : vector<8x512xi1> to vector<8x512xi32>
    %19 = arith.sitofp %18 : vector<8x512xi32> to vector<8x512xf32>
    %20 = arith.addf %5, %19 : vector<8x512xf32>
    %21 = vector.extract_strided_slice %3 {offsets = [0, 1], sizes = [8, 1], strides = [1, 1]} : vector<8x4xi32> to vector<8x1xi32>
    %c0_i32_1 = arith.constant 0 : i32
    %22 = vector.broadcast %c0_i32_1 : i32 to vector<8x1xi32>
    %23 = arith.cmpi sge, %21, %22 : vector<8x1xi32>
    %c128_i32_2 = arith.constant 128 : i32
    %24 = vector.broadcast %c128_i32_2 : i32 to vector<8x1xi32>
    %25 = arith.cmpi slt, %21, %24 : vector<8x1xi32>
    %26 = arith.andi %23, %25 : vector<8x1xi1>
    %c128_i32_3 = arith.constant 128 : i32
    %27 = vector.broadcast %c128_i32_3 : i32 to vector<8x1xi32>
    %28 = arith.addi %21, %27 : vector<8x1xi32>
    %c-1_i32_4 = arith.constant -1 : i32
    %29 = vector.broadcast %c-1_i32_4 : i32 to vector<8x1xi32>
    %30 = arith.select %26, %28, %29 : vector<8x1xi1>, vector<8x1xi32>
    %31 = vector.broadcast %30 : vector<8x1xi32> to vector<8x512xi32>
    %32 = arith.cmpi eq, %4, %31 : vector<8x512xi32>
    %33 = arith.extui %32 : vector<8x512xi1> to vector<8x512xi32>
    %34 = arith.sitofp %33 : vector<8x512xi32> to vector<8x512xf32>
    %35 = arith.addf %20, %34 : vector<8x512xf32>
    %36 = vector.extract_strided_slice %3 {offsets = [0, 2], sizes = [8, 1], strides = [1, 1]} : vector<8x4xi32> to vector<8x1xi32>
    %c0_i32_5 = arith.constant 0 : i32
    %37 = vector.broadcast %c0_i32_5 : i32 to vector<8x1xi32>
    %38 = arith.cmpi sge, %36, %37 : vector<8x1xi32>
    %c128_i32_6 = arith.constant 128 : i32
    %39 = vector.broadcast %c128_i32_6 : i32 to vector<8x1xi32>
    %40 = arith.cmpi slt, %36, %39 : vector<8x1xi32>
    %41 = arith.andi %38, %40 : vector<8x1xi1>
    %c256_i32 = arith.constant 256 : i32
    %42 = vector.broadcast %c256_i32 : i32 to vector<8x1xi32>
    %43 = arith.addi %36, %42 : vector<8x1xi32>
    %c-1_i32_7 = arith.constant -1 : i32
    %44 = vector.broadcast %c-1_i32_7 : i32 to vector<8x1xi32>
    %45 = arith.select %41, %43, %44 : vector<8x1xi1>, vector<8x1xi32>
    %46 = vector.broadcast %45 : vector<8x1xi32> to vector<8x512xi32>
    %47 = arith.cmpi eq, %4, %46 : vector<8x512xi32>
    %48 = arith.extui %47 : vector<8x512xi1> to vector<8x512xi32>
    %49 = arith.sitofp %48 : vector<8x512xi32> to vector<8x512xf32>
    %50 = arith.addf %35, %49 : vector<8x512xf32>
    %51 = vector.extract_strided_slice %3 {offsets = [0, 3], sizes = [8, 1], strides = [1, 1]} : vector<8x4xi32> to vector<8x1xi32>
    %c0_i32_8 = arith.constant 0 : i32
    %52 = vector.broadcast %c0_i32_8 : i32 to vector<8x1xi32>
    %53 = arith.cmpi sge, %51, %52 : vector<8x1xi32>
    %c128_i32_9 = arith.constant 128 : i32
    %54 = vector.broadcast %c128_i32_9 : i32 to vector<8x1xi32>
    %55 = arith.cmpi slt, %51, %54 : vector<8x1xi32>
    %56 = arith.andi %53, %55 : vector<8x1xi1>
    %c384_i32 = arith.constant 384 : i32
    %57 = vector.broadcast %c384_i32 : i32 to vector<8x1xi32>
    %58 = arith.addi %51, %57 : vector<8x1xi32>
    %c-1_i32_10 = arith.constant -1 : i32
    %59 = vector.broadcast %c-1_i32_10 : i32 to vector<8x1xi32>
    %60 = arith.select %56, %58, %59 : vector<8x1xi1>, vector<8x1xi32>
    %61 = vector.broadcast %60 : vector<8x1xi32> to vector<8x512xi32>
    %62 = arith.cmpi eq, %4, %61 : vector<8x512xi32>
    %63 = arith.extui %62 : vector<8x512xi1> to vector<8x512xi32>
    %64 = arith.sitofp %63 : vector<8x512xi32> to vector<8x512xf32>
    %65 = arith.addf %50, %64 : vector<8x512xf32>
    %c0_11 = arith.constant 0 : index
    %c0_12 = arith.constant 0 : index
    %66 = vector.load %arg2[%c0_11, %c0_12] : memref<512x128xf32, #tpu.memory_space<vmem>>, vector<512x128xf32>
    %cst_13 = arith.constant dense<0.000000e+00> : vector<8x128xf32>
    %67 = tpu.matmul %65, %66, %cst_13 {dimension_numbers = #tpu.dot_dimension_numbers<[1], [0], [0], [1], [0, 0, 1, 1], [], []>} : vector<8x512xf32>, vector<512x128xf32>, vector<8x128xf32> -> vector<8x128xf32>
    %c0_14 = arith.constant 0 : index
    %c0_15 = arith.constant 0 : index
    %68 = vector.load %arg3[%c0_14, %c0_15] : memref<8x128xf32, #tpu.memory_space<vmem>>, vector<8x128xf32>
    tpu.vector_store %arg3[%c0_14, %c0_15], %67 {strides = array<i32>} : memref<8x128xf32, #tpu.memory_space<vmem>>, vector<8x128xf32>,
    return
  }
  func.func @transform_0(%arg0: i32) -> (i32, i32) {
    %c0_i32 = arith.constant 0 : i32
    %c0_i32_0 = arith.constant 0 : i32
    %c0_i32_1 = arith.constant 0 : i32
    return %c0_i32, %c0_i32_0 : i32, i32
  }
  func.func @transform_1(%arg0: i32) -> (i32, i32) {
    %c0_i32 = arith.constant 0 : i32
    %c0_i32_0 = arith.constant 0 : i32
    %c0_i32_1 = arith.constant 0 : i32
    return %c0_i32, %c0_i32_0 : i32, i32
  }
  func.func @transform_2(%arg0: i32) -> (i32, i32) {
    %c0_i32 = arith.constant 0 : i32
    %c0_i32_0 = arith.constant 0 : i32
    return %arg0, %c0_i32 : i32, i32
  }
}

</mosaic_0001>

<bundles_post_ra>
// kernel: embedding_forward.1
= control target key start
LH: loop header
LB: loop body
LE: loop exit
PB: predicated region body
PF: predicated region fallthrough
CT: control target
= control target key end

     0   :  { %v474_v0 = vmov 0   ;;  %v475_v2 = vmov 2   ;;  %v476_v41 = vmov 1   ;;  %v477_v42 = vmov 3   ;;  %s705_s0 = inlined_call_operand.vmem [shape: s32[8,4], index: 0, kind: input, shape index: {}]   ;;  %s706_s1 = inlined_call_operand.vmem [shape: f32[512,128], index: 1, kind: input, shape index: {}]   ;;  %s707_s2 = inlined_call_operand.vmem [shape: f32[8,128], index: 2, kind: output, shape index: {}]  }
   0x1   :  { %469 = vset.pattern.permute.xlu0 %v474_v0  ;;  %v13_v1 = vld [vmem:[%s705_s0] sm:$0xff]  ;;  %471 = vset.pattern.permute.xlu1 %v475_v2  ;;  %v122_v4 = vld [vmem:[%s706_s1 + $0x88] sm:$0xff]  ;;  %v123_v20 = vld [vmem:[%s706_s1 + $0x90] sm:$0xff] }
   0x2   :  { %v121_v3 = vld [vmem:[%s706_s1 + $0x80] sm:$0xff]  ;;  %vm19_vm0 = vcmp.ge.s32.totalorder %v13_v1, 0  ;;  %vm20_vm1 = vcmp.lt.s32.totalorder %v13_v1, 128  ;;  %v63_v5 = vadd.s32 256, %v13_v1  ;;  %v154_v7 = vld [vmem:[%s706_s1 + $0x188] sm:$0xff]  ;;  %v42_v9 = vadd.s32 128, %v13_v1 }
   0x3   :  { %v153_v6 = vld [vmem:[%s706_s1 + $0x180] sm:$0xff]  ;;  %vm509_vm2 = vmand %vm19_vm0, %vm20_vm1  ;;  %v84_v10 = vadd.s32 384, %v13_v1  ;;  %v400_v11 = vpack.c.bf16 %v122_v4, %v121_v3  ;;  %v106_v14 = vld [vmem:[%s706_s1 + $0x8] sm:$0xff] }
   0x4   :  { %v432_v12 = vpack.c.bf16 %v154_v7, %v153_v6  ;;  %v105_v13 = vld [vmem:[%s706_s1] sm:$0xff]  ;;  %v22_v15 = vsel %vm509_vm2, %v13_v1, 4294967295  ;;  %v64_v16 = vsel %vm509_vm2, %v63_v5, 4294967295  ;;  %v138_v19 = vld [vmem:[%s706_s1 + $0x108] sm:$0xff]  ;;  %v124_v22 = vld [vmem:[%s706_s1 + $0x98] sm:$0xff]  ;;  %v43_v30 = vsel %vm509_vm2, %v42_v9, 4294967295 }
   0x5   :  { %v402_v17 = vpack.c.bf16 %v106_v14, %v105_v13  ;;  %v137_v18 = vld [vmem:[%s706_s1 + $0x100] sm:$0xff]  ;;  %24 = vperm.xlu0 %469, %v22_v15   ;;  %66 = vperm.xlu1 %471, %v64_v16   ;;  %v155_v23 = vld [vmem:[%s706_s1 + $0x190] sm:$0xff]  ;;  %v156_v24 = vld [vmem:[%s706_s1 + $0x198] sm:$0xff]  ;;  %v404_v25 = vpack.c.bf16 %v124_v22, %v123_v20  ;;  %v85_v31 = vsel %vm509_vm2, %v84_v10, 4294967295 }
   0x6   :  { %v434_v21 = vpack.c.bf16 %v138_v19, %v137_v18  ;;  %401 = vmatprep.subr.bf16.mxu0 %v400_v11  ;;  %433 = vmatprep.subr.bf16.mxu1 %v432_v12  ;;  %v436_v26 = vpack.c.bf16 %v156_v24, %v155_v23  ;;  %v107_v27 = vld [vmem:[%s706_s1 + $0x10] sm:$0xff]  ;;  %v108_v28 = vld [vmem:[%s706_s1 + $0x18] sm:$0xff]  ;;  %v125_v34 = vld [vmem:[%s706_s1 + $0xa0] sm:$0xff] }
   0x7   :  { %v139_v29 = vld [vmem:[%s706_s1 + $0x110] sm:$0xff]  ;;  %403 = vmatpush3.bf16.msra.mxu0 %v402_v17  ;;  %v406_v32 = vpack.c.bf16 %v108_v28, %v107_v27  ;;  %v140_v33 = vld [vmem:[%s706_s1 + $0x118] sm:$0xff]  ;;  %v126_v35 = vld [vmem:[%s706_s1 + $0xa8] sm:$0xff] }
   0x8   :  { %435 = vmatpush3.bf16.msra.mxu1 %v434_v21  ;;  %405 = vmatprep.subr.bf16.mxu0 %v404_v25  ;;  %v438_v36 = vpack.c.bf16 %v140_v33, %v139_v29  ;;  %v408_v37 = vpack.c.bf16 %v126_v35, %v125_v34  ;;  %v157_v38 = vld [vmem:[%s706_s1 + $0x1a0] sm:$0xff]  ;;  %v158_v39 = vld [vmem:[%s706_s1 + $0x1a8] sm:$0xff]  ;;  %v127_v47 = vld [vmem:[%s706_s1 + $0xb0] sm:$0xff] }
   0x9   :  { %437 = vmatprep.subr.bf16.mxu1 %v436_v26  ;;  %v109_v40 = vld [vmem:[%s706_s1 + $0x20] sm:$0xff]  ;;  %470 = vset.pattern.permute.xlu0 %v476_v41  ;;  %v440_v43 = vpack.c.bf16 %v158_v39, %v157_v38  ;;  %v110_v44 = vld [vmem:[%s706_s1 + $0x28] sm:$0xff]  ;;  %v128_v48 = vld [vmem:[%s706_s1 + $0xb8] sm:$0xff] }
   0xa   :  { %472 = vset.pattern.permute.xlu1 %v477_v42  ;;  %v141_v45 = vld [vmem:[%s706_s1 + $0x120] sm:$0xff]  ;;  %v142_v46 = vld [vmem:[%s706_s1 + $0x128] sm:$0xff]  ;;  %45 = vperm.xlu0 %470, %v43_v30   ;;  %v159_v49 = vld [vmem:[%s706_s1 + $0x1b0] sm:$0xff]  ;;  %v410_v50 = vpack.c.bf16 %v110_v44, %v109_v40  ;;  %v412_v55 = vpack.c.bf16 %v128_v48, %v127_v47 }
   0xb   :  { %87 = vperm.xlu1 %472, %v85_v31   ;;  %407 = vmatpush3.bf16.msra.mxu0 %v406_v32  ;;  %v442_v51 = vpack.c.bf16 %v142_v46, %v141_v45  ;;  %v160_v52 = vld [vmem:[%s706_s1 + $0x1b8] sm:$0xff]  ;;  %v111_v53 = vld [vmem:[%s706_s1 + $0x30] sm:$0xff]  ;;  %v129_v59 = vld [vmem:[%s706_s1 + $0xc0] sm:$0xff]  ;;  %v14_v45 = vlaneseq }
   0xc   :  { %439 = vmatpush3.bf16.msra.mxu1 %v438_v36  ;;  %v112_v54 = vld [vmem:[%s706_s1 + $0x38] sm:$0xff]  ;;  %409 = vmatprep.subr.bf16.mxu0 %v408_v37  ;;  %v444_v56 = vpack.c.bf16 %v160_v52, %v159_v49  ;;  %v143_v57 = vld [vmem:[%s706_s1 + $0x130] sm:$0xff]  ;;  %v130_v60 = vld [vmem:[%s706_s1 + $0xc8] sm:$0xff]  ;;  %v478_v52 = vmov 0.0  }
   0xd   :  { %441 = vmatprep.subr.bf16.mxu1 %v440_v43  ;;  %v144_v58 = vld [vmem:[%s706_s1 + $0x138] sm:$0xff]  ;;  %v161_v61 = vld [vmem:[%s706_s1 + $0x1c0] sm:$0xff]  ;;  %v162_v62 = vld [vmem:[%s706_s1 + $0x1c8] sm:$0xff]  ;;  %v414_v63 = vpack.c.bf16 %v112_v54, %v111_v53  ;;  %v416_v3 = vpack.c.bf16 %v130_v60, %v129_v59  ;;  %v15_v46 = vand.u32 127, %v14_v45 }
   0xe   :  { %473 = vset.pattern.permute.xlu0 %v477_v42  ;;  %v446_v0 = vpack.c.bf16 %v144_v58, %v143_v57  ;;  %v113_v1 = vld [vmem:[%s706_s1 + $0x40] sm:$0xff]  ;;  %v114_v2 = vld [vmem:[%s706_s1 + $0x48] sm:$0xff]  ;;  %v448_v4 = vpack.c.bf16 %v162_v62, %v161_v61  ;;  %v131_v7 = vld [vmem:[%s706_s1 + $0xd0] sm:$0xff] }
   0xf   :  { %411 = vmatpush3.bf16.msra.mxu0 %v410_v50  ;;  %v145_v5 = vld [vmem:[%s706_s1 + $0x140] sm:$0xff]  ;;  %v146_v6 = vld [vmem:[%s706_s1 + $0x148] sm:$0xff]  ;;  %v132_v8 = vld [vmem:[%s706_s1 + $0xd8] sm:$0xff]  ;;  %v418_v11 = vpack.c.bf16 %v114_v2, %v113_v1  ;;  %v17_v47 = vadd.s32 256, %v15_v46  ;;  %v16_v48 = vadd.s32 128, %v15_v46  ;;  %v18_v49 = vadd.s32 384, %v15_v46 }
  0x10   :  { %443 = vmatpush3.bf16.msra.mxu1 %v442_v51  ;;  %413 = vmatprep.subr.bf16.mxu0 %v412_v55  ;;  %v163_v9 = vld [vmem:[%s706_s1 + $0x1d0] sm:$0xff]  ;;  %v164_v10 = vld [vmem:[%s706_s1 + $0x1d8] sm:$0xff]  ;;  %v450_v12 = vpack.c.bf16 %v146_v6, %v145_v5  ;;  %v420_v15 = vpack.c.bf16 %v132_v8, %v131_v7  ;;  %v133_v19 = vld [vmem:[%s706_s1 + $0xe0] sm:$0xff] }
  0x11   :  { %445 = vmatprep.subr.bf16.mxu1 %v444_v56  ;;  %v115_v13 = vld [vmem:[%s706_s1 + $0x50] sm:$0xff]  ;;  %v116_v14 = vld [vmem:[%s706_s1 + $0x58] sm:$0xff]  ;;  %v452_v16 = vpack.c.bf16 %v164_v10, %v163_v9  ;;  %v134_v20 = vld [vmem:[%s706_s1 + $0xe8] sm:$0xff] }
  0x12   :  { %v147_v17 = vld [vmem:[%s706_s1 + $0x150] sm:$0xff]  ;;  %v148_v18 = vld [vmem:[%s706_s1 + $0x158] sm:$0xff]  ;;  %v165_v21 = vld [vmem:[%s706_s1 + $0x1e0] sm:$0xff]  ;;  %v422_v23 = vpack.c.bf16 %v116_v14, %v115_v13  ;;  %v424_v27 = vpack.c.bf16 %v134_v20, %v133_v19 }
  0x13   :  { %415 = vmatpush3.bf16.msra.mxu0 %v414_v63  ;;  %v166_v22 = vld [vmem:[%s706_s1 + $0x1e8] sm:$0xff]  ;;  %v454_v24 = vpack.c.bf16 %v148_v18, %v147_v17  ;;  %v117_v25 = vld [vmem:[%s706_s1 + $0x60] sm:$0xff]  ;;  %v135_v31 = vld [vmem:[%s706_s1 + $0xf0] sm:$0xff] }
  0x14   :  { %447 = vmatpush3.bf16.msra.mxu1 %v446_v0  ;;  %417 = vmatprep.subr.bf16.mxu0 %v416_v3  ;;  %v118_v26 = vld [vmem:[%s706_s1 + $0x68] sm:$0xff]  ;;  %v456_v28 = vpack.c.bf16 %v166_v22, %v165_v21  ;;  %v149_v29 = vld [vmem:[%s706_s1 + $0x160] sm:$0xff]  ;;  %v136_v32 = vld [vmem:[%s706_s1 + $0xf8] sm:$0xff] }
  0x15   :  { %449 = vmatprep.subr.bf16.mxu1 %v448_v4  ;;  %v150_v30 = vld [vmem:[%s706_s1 + $0x168] sm:$0xff]  ;;  %v167_v33 = vld [vmem:[%s706_s1 + $0x1f0] sm:$0xff]  ;;  %v168_v34 = vld [vmem:[%s706_s1 + $0x1f8] sm:$0xff]  ;;  %v426_v35 = vpack.c.bf16 %v118_v26, %v117_v25  ;;  %v428_v38 = vpack.c.bf16 %v136_v32, %v135_v31 }
  0x16   :  { %v458_v36 = vpack.c.bf16 %v150_v30, %v149_v29  ;;  %v119_v37 = vld [vmem:[%s706_s1 + $0x70] sm:$0xff]  ;;  %v460_v39 = vpack.c.bf16 %v168_v34, %v167_v33  ;;  %v120_v40 = vld [vmem:[%s706_s1 + $0x78] sm:$0xff] }
  0x17   :  { %419 = vmatpush3.bf16.msra.mxu0 %v418_v11  ;;  %v151_v41 = vld [vmem:[%s706_s1 + $0x170] sm:$0xff]  ;;  %v152_v42 = vld [vmem:[%s706_s1 + $0x178] sm:$0xff]  ;;  %v430_v43 = vpack.c.bf16 %v120_v40, %v119_v37 }
  0x18   :  { %451 = vmatpush3.bf16.msra.mxu1 %v450_v12  ;;  %421 = vmatprep.subr.bf16.mxu0 %v420_v15  ;;  %v462_v44 = vpack.c.bf16 %v152_v42, %v151_v41 }
  0x19   :  { %453 = vmatprep.subr.bf16.mxu1 %v452_v16 }
  0x1b   :  { %423 = vmatpush3.bf16.msra.mxu0 %v422_v23 }
  0x1c   :  { %455 = vmatpush3.bf16.msra.mxu1 %v454_v24  ;;  %425 = vmatprep.subr.bf16.mxu0 %v424_v27 }
  0x1d   :  { %457 = vmatprep.subr.bf16.mxu1 %v456_v28 }
  0x1f   :  { %427 = vmatpush3.bf16.msra.mxu0 %v426_v35 }
  0x20   :  { %459 = vmatpush3.bf16.msra.mxu1 %v458_v36  ;;  %429 = vmatprep.subr.bf16.mxu0 %v428_v38 }
  0x21   :  { %461 = vmatprep.subr.bf16.mxu1 %v460_v39 }
  0x23   :  { %431 = vmatpush3.bf16.msra.mxu0 %v430_v43 }
  0x24   :  { %463 = vmatpush3.bf16.msra.mxu1 %v462_v44 }
  0x84   :  { %v25_v50 = vpop.permute.xlu0 %24  ;;  %v67_v51 = vpop.permute.xlu1 %66 }
  0x85   :  { %vm26_vm3 = vcmp.eq.s32.totalorder %v15_v46, %v25_v50  ;;  %vm28_vm4 = vcmp.eq.s32.totalorder %v17_v47, %v25_v50  ;;  %vm27_vm5 = vcmp.eq.s32.totalorder %v16_v48, %v25_v50  ;;  %vm29_vm6 = vcmp.eq.s32.totalorder %v18_v49, %v25_v50 }
  0x86   :  { %vm68_vm7 = vcmp.eq.s32.totalorder %v15_v46, %v67_v51  ;;  %vm70_vm8 = vcmp.eq.s32.totalorder %v17_v47, %v67_v51  ;;  %vm69_vm9 = vcmp.eq.s32.totalorder %v16_v48, %v67_v51  ;;  %v314_v55 = vsel %vm26_vm3, 1.0, %v478_v52 }
  0x87   :  { %v322_v53 = vsel %vm68_vm7, 1.0, %v478_v52  ;;  %v324_v54 = vsel %vm70_vm8, 1.0, %v478_v52  ;;  %v316_v56 = vsel %vm28_vm4, 1.0, %v478_v52  ;;  %v315_v59 = vsel %vm27_vm5, 1.0, %v478_v52 }
  0x88   :  { %v323_v60 = vsel %vm69_vm9, 1.0, %v478_v52  ;;  %v317_v61 = vsel %vm29_vm6, 1.0, %v478_v52  ;;  %vm71_vm10 = vcmp.eq.s32.totalorder %v18_v49, %v67_v51 }
  0x89   :  { %v46_v57 = vpop.permute.xlu0 %45  ;;  %v325_v11 = vsel %vm71_vm10, 1.0, %v478_v52 }
  0x8a   :  { %v88_v58 = vpop.permute.xlu1 %87  ;;  %vm47_vm11 = vcmp.eq.s32.totalorder %v15_v46, %v46_v57  ;;  %vm48_vm12 = vcmp.eq.s32.totalorder %v16_v48, %v46_v57  ;;  %vm49_vm13 = vcmp.eq.s32.totalorder %v17_v47, %v46_v57  ;;  %vm50_vm14 = vcmp.eq.s32.totalorder %v18_v49, %v46_v57 }
  0x8b   :  { %v318_v62 = vsel %vm47_vm11, 1.0, %v478_v52  ;;  %v319_v63 = vsel %vm48_vm12, 1.0, %v478_v52  ;;  %v320_v0 = vsel %vm49_vm13, 1.0, %v478_v52  ;;  %v321_v1 = vsel %vm50_vm14, 1.0, %v478_v52 }
  0x8c   :  { %v59_v2 = vadd.f32 %v318_v62, %v314_v55  ;;  %v61_v3 = vadd.f32 %v320_v0, %v316_v56  ;;  %vm89_vm15 = vcmp.eq.s32.totalorder %v15_v46, %v88_v58  ;;  %vm91_vm0 = vcmp.eq.s32.totalorder %v17_v47, %v88_v58 }
  0x8d   :  { %v326_v4 = vsel %vm89_vm15, 1.0, %v478_v52  ;;  %v328_v5 = vsel %vm91_vm0, 1.0, %v478_v52  ;;  %v60_v6 = vadd.f32 %v319_v63, %v315_v59  ;;  %vm90_vm1 = vcmp.eq.s32.totalorder %v16_v48, %v88_v58 }
  0x8e   :  { %v327_v7 = vsel %vm90_vm1, 1.0, %v478_v52  ;;  %v62_v8 = vadd.f32 %v321_v1, %v317_v61  ;;  %vm92_vm2 = vcmp.eq.s32.totalorder %v18_v49, %v88_v58  ;;  %v80_v9 = vadd.f32 %v322_v53, %v59_v2 }
  0x8f   :  { %v81_v10 = vadd.f32 %v323_v60, %v60_v6  ;;  %v329_v12 = vsel %vm92_vm2, 1.0, %v478_v52  ;;  %v82_v13 = vadd.f32 %v324_v54, %v61_v3 }
  0x90   :  { %v83_v14 = vadd.f32 %v325_v11, %v62_v8  ;;  %v101_v15 = vadd.f32 %v326_v4, %v80_v9 }
  0x91   :  { %v102_v16 = vadd.f32 %v327_v7, %v81_v10  ;;  %v103_v17 = vadd.f32 %v328_v5, %v82_v13 }
  0x92   :  { %v104_v18 = vadd.f32 %v329_v12, %v83_v14 }
  0x93   :  { %233 = vmatprep.mubr.f32.mxu0 %v102_v16 }
  0x94   :  { %303 = vmatprep.mubr.f32.mxu1 %v104_v18  ;;  %234 = vmatmul.mubr.f32.vlgmr.msra.gmra.mrb[0].mxu0 %v101_v15 }
  0x95   :  { %304 = vmatmul.mubr.f32.vlgmr.msra.gmra.mrb[0].mxu1 %v103_v17 }
 0x167   :  { %v362_v19 = vpop.f32.mrb[0].mxu0 }
 0x168   :  { %v397_v20 = vpop.f32.mrb[0].mxu1  ;;  %v363_v21 = vpop.f32.mrb[1].mxu0 }
 0x169   :  { %v364_v22 = vadd.f32 %v363_v21, %v362_v19  ;;  %v398_v23 = vpop.f32.mrb[1].mxu1 }
 0x16a   :  { %v399_v24 = vadd.f32 %v398_v23, %v397_v20 }
 0x16c   :  { %v306_v25 = vadd.f32 %v399_v24, %v364_v22 }
 0x16e   :  { %309 = vst [vmem:[%s707_s2] sm:$0xff] %v306_v25 }

</bundles_post_ra>
